<compile_context>
chip_gen: v7x
topology: tpu7x:2x2x1
jax: 0.10.0
libtpu: 0.0.40
codegen_flags: <defaults>
</compile_context>

<pallas_src>
import jax
import jax.numpy as jnp
from jax.experimental import pallas as pl
from jax.experimental.pallas import tpu as pltpu

IN_CH = 1536        # swin_large final embedding dim
NUM_CLASSES = 90    # disease classes
NUM_TOKENS = 49     # 7x7 tokens for 224x224 input, patch 4, window 7
BATCH = 2


def _head_kernel(x_ref, w_ref, b_ref, o_ref):
    """classifer head: token mean-pool + Linear, pool-first matmul order.

    x_ref: (B*L, C)  f32   flattened backbone features
    w_ref: (C, N)    bf16  fc weight (transposed, no padding)
    b_ref: (1, N)    f32   fc bias
    o_ref: (B, N)    f32   logits
    """
    B = o_ref.shape[0]
    BL = x_ref.shape[0]
    L = BL // B

    # Pooling matrix built in-kernel (no input DMA): P[b, t] = 1 iff token t
    # belongs to batch row b. Iota/where run on the VPU under the DMA shadow.
    row = jax.lax.broadcasted_iota(jnp.int32, (B, BL), 0)
    col = jax.lax.broadcasted_iota(jnp.int32, (B, BL), 1)
    p = jnp.where((col >= row * L) & (col < (row + 1) * L),
                  jnp.float32(1.0), jnp.float32(0.0))

    # Pool first: (B, B*L) @ (B*L, C) -> (B, C), f32 sums; 1/L applied in f32.
    pooled = jnp.dot(p, x_ref[...], preferred_element_type=jnp.float32)
    pooled = pooled * jnp.float32(1.0 / L)

    # Project: bf16 x bf16 on the MXU with f32 accumulation, f32 bias epilogue.
    logits = jnp.dot(pooled.astype(jnp.bfloat16), w_ref[...],
                     preferred_element_type=jnp.float32)
    o_ref[...] = logits + b_ref[...]


def swin_head(features, w_kernel, b_kernel):
    """Pallas call wrapping the classifer head.

    features: (B, L, C) float32           -- backbone features (timm token layout)
    w_kernel: (C, num_classes) bfloat16   -- pre-packed at init (see prepare_head_params)
    b_kernel: (1, num_classes) float32    -- pre-packed at init
    returns:  (B, num_classes) float32 logits
    """
    B, L, C = features.shape
    n_cls = w_kernel.shape[1]

    # Free contiguous reshape; features are consumed in f32 (no bf16 copy).
    x_flat = features.reshape(B * L, C)

    cost = pl.CostEstimate(
        flops=2 * B * (B * L) * C + 2 * B * C * n_cls,
        transcendentals=0,
        bytes_accessed=(B * L * C * 4) + (C * n_cls * 2) + (n_cls * 4)
                       + (B * n_cls * 4),
    )

    out = pl.pallas_call(
        _head_kernel,
        out_shape=jax.ShapeDtypeStruct((B, n_cls), jnp.float32),
        # Single grid point; all operands (<1 MiB) fit in VMEM, so every block
        # is the full array (full-extent blocks satisfy the (8,128) rule).
        in_specs=[
            pl.BlockSpec((B * L, C), lambda: (0, 0)),
            pl.BlockSpec((C, n_cls), lambda: (0, 0)),
            pl.BlockSpec((1, n_cls), lambda: (0, 0)),
        ],
        out_specs=pl.BlockSpec((B, n_cls), lambda: (0, 0)),
        compiler_params=pltpu.CompilerParams(vmem_limit_bytes=8 << 20),
        cost_estimate=cost,
    )(x_flat, w_kernel, b_kernel)
    return out


def init_head_params(key, in_ch=IN_CH, num_classes=NUM_CLASSES):
    """Deterministic nn.Linear-style init (uniform +-1/sqrt(in_ch)), f32 masters."""
    kw, kb = jax.random.split(key)
    bound = 1.0 / jnp.sqrt(jnp.float32(in_ch))
    # Stored as [in_ch, num_classes] (transpose of PyTorch fc.weight layout).
    w = jax.random.uniform(kw, (in_ch, num_classes), jnp.float32, -bound, bound)
    b = jax.random.uniform(kb, (num_classes,), jnp.float32, -bound, bound)
    return w, b


def prepare_head_params(w, b):
    """One-time packing of the fc params into kernel-ready form (hoisted out of
    the per-call path): bf16 weight (C, N), f32 bias (1, N)."""
    w_kernel = w.astype(jnp.bfloat16)
    b_kernel = b.astype(jnp.float32).reshape(1, -1)
    return w_kernel, b_kernel


if __name__ == "__main__":
    key = jax.random.PRNGKey(0)
    k_feat, k_params = jax.random.split(key)

    # Synthetic backbone features: [B, L, C] = [2, 49, 1536].
    # (The real module would produce these from a [B, 3, 224, 224] image via the
    #  frozen pretrained Swin backbone -- see TODO(synk) above.)
    feats = jax.random.normal(k_feat, (BATCH, NUM_TOKENS, IN_CH), jnp.float32)
    w, b = init_head_params(k_params)
    w_kernel, b_kernel = prepare_head_params(w, b)   # done once, not per call

    out = swin_head(feats, w_kernel, b_kernel)
    out = jax.block_until_ready(out)

    # Pure-JAX reference of the PyTorch head semantics, matching the kernel's
    # numerics: f32 mean-pool, pooled cast to bf16, bf16 weight, f32 accumulate.
    pooled_ref = jnp.mean(feats, axis=1)
    pooled_ref = pooled_ref.astype(jnp.bfloat16).astype(jnp.float32)
    w_ref = w.astype(jnp.bfloat16).astype(jnp.float32)
    ref = pooled_ref @ w_ref + b

    assert out.shape == (BATCH, NUM_CLASSES)
    assert jnp.allclose(out, ref, atol=1e-2, rtol=1e-2), "mismatch vs reference"

    print("KERNEL_OK")
</pallas_src>

<mosaic_0001>
module attributes {stable_mosaic.version = 11 : i64} {
  func.func @_head_kernel(%arg0: memref<98x1536xf32, #tpu.memory_space<vmem>>, %arg1: memref<1536x90xbf16, #tpu.memory_space<vmem>>, %arg2: memref<1x90xf32, #tpu.memory_space<vmem>>, %arg3: memref<2x90xf32, #tpu.memory_space<vmem>>) attributes {dimension_semantics = [], scalar_prefetch = 0 : i64, scratch_operands = 0 : i64, tpu.core_type = #tpu.core_type<tc>} {
    %0 = tpu.iota {dimensions = array<i32: 0>} : vector<2x98xi32>
    %1 = tpu.iota {dimensions = array<i32: 1>} : vector<2x98xi32>
    %c49_i32 = arith.constant 49 : i32
    %2 = vector.broadcast %c49_i32 : i32 to vector<2x98xi32>
    %3 = arith.muli %0, %2 : vector<2x98xi32>
    %4 = arith.cmpi sge, %1, %3 : vector<2x98xi32>
    %c1_i32 = arith.constant 1 : i32
    %5 = vector.broadcast %c1_i32 : i32 to vector<2x98xi32>
    %6 = arith.addi %0, %5 : vector<2x98xi32>
    %c49_i32_0 = arith.constant 49 : i32
    %7 = vector.broadcast %c49_i32_0 : i32 to vector<2x98xi32>
    %8 = arith.muli %6, %7 : vector<2x98xi32>
    %9 = arith.cmpi slt, %1, %8 : vector<2x98xi32>
    %10 = arith.andi %4, %9 : vector<2x98xi1>
    %cst = arith.constant 1.000000e+00 : f32
    %cst_1 = arith.constant 0.000000e+00 : f32
    %11 = vector.broadcast %cst : f32 to vector<2x98xf32>
    %12 = vector.broadcast %cst_1 : f32 to vector<2x98xf32>
    %13 = arith.select %10, %11, %12 : vector<2x98xi1>, vector<2x98xf32>
    %c0 = arith.constant 0 : index
    %c0_2 = arith.constant 0 : index
    %14 = vector.load %arg0[%c0, %c0_2] : memref<98x1536xf32, #tpu.memory_space<vmem>>, vector<98x1536xf32>
    %cst_3 = arith.constant dense<0.000000e+00> : vector<2x1536xf32>
    %15 = tpu.matmul %13, %14, %cst_3 {dimension_numbers = #tpu.dot_dimension_numbers<[1], [0], [0], [1], [0, 0, 1, 1], [], []>} : vector<2x98xf32>, vector<98x1536xf32>, vector<2x1536xf32> -> vector<2x1536xf32>
    %cst_4 = arith.constant 0.0204081628 : f32
    %16 = vector.broadcast %cst_4 : f32 to vector<2x1536xf32>
    %17 = arith.mulf %15, %16 : vector<2x1536xf32>
    %18 = arith.truncf %17 : vector<2x1536xf32> to vector<2x1536xbf16>
    %c0_5 = arith.constant 0 : index
    %c0_6 = arith.constant 0 : index
    %19 = vector.load %arg1[%c0_5, %c0_6] : memref<1536x90xbf16, #tpu.memory_space<vmem>>, vector<1536x90xbf16>
    %cst_7 = arith.constant dense<0.000000e+00> : vector<2x90xf32>
    %20 = tpu.matmul %18, %19, %cst_7 {dimension_numbers = #tpu.dot_dimension_numbers<[1], [0], [0], [1], [0, 0, 1, 1], [], []>} : vector<2x1536xbf16>, vector<1536x90xbf16>, vector<2x90xf32> -> vector<2x90xf32>
    %c0_8 = arith.constant 0 : index
    %c0_9 = arith.constant 0 : index
    %21 = vector.load %arg2[%c0_8, %c0_9] : memref<1x90xf32, #tpu.memory_space<vmem>>, vector<1x90xf32>
    %22 = vector.broadcast %21 : vector<1x90xf32> to vector<2x90xf32>
    %23 = arith.addf %20, %22 : vector<2x90xf32>
    %c0_10 = arith.constant 0 : index
    %c0_11 = arith.constant 0 : index
    %24 = vector.load %arg3[%c0_10, %c0_11] : memref<2x90xf32, #tpu.memory_space<vmem>>, vector<2x90xf32>
    tpu.vector_store %arg3[%c0_10, %c0_11], %23 {strides = array<i32>} : memref<2x90xf32, #tpu.memory_space<vmem>>, vector<2x90xf32>,
    return
  }
}

</mosaic_0001>

<bundles_post_ra>
// kernel: tpu_custom_call.1
= control target key start
LH: loop header
LB: loop body
LE: loop exit
PB: predicated region body
PF: predicated region fallthrough
CT: control target
= control target key end

     0   :  { %v2218_v7 = vmov 0.0   ;;  %v16_v17 = vlaneseq  ;;  %vm187_vm2 = vcmask 1041408   ;;  %vm183_vm4 = vcmask 801792   ;;  %s3061_s0 = inlined_call_operand.vmem [shape: f32[98,1536], index: 0, kind: input, shape index: {}]   ;;  %s3062_s1 = inlined_call_operand.vmem [shape: bf16[1536,90], index: 1, kind: input, shape index: {}]   ;;  %s3063_s2 = inlined_call_operand.vmem [shape: f32[1,90], index: 2, kind: input, shape index: {}]   ;;  %s3064_s3 = inlined_call_operand.hbm [shape: f32[2,90], index: 3, kind: output, shape index: {}]  }
   0x1   :  { %v28_v0 = vld [vmem:[%s3061_s0 + $0x8] sm:$0xff]  ;;  %v30_v2 = vld [vmem:[%s3061_s0 + $0x18] sm:$0xff]  ;;  %v27_v5 = vld [vmem:[%s3061_s0] sm:$0xff]  ;;  %288 = vmatprep.mubr.f32.mxu0 %v2218_v7  ;;  %359 = vmatprep.mubr.f32.mxu1 %v2218_v7 }
   0x2   :  { %v40_v1 = vld [vmem:[%s3061_s0 + $0x68] sm:$0xff]  ;;  %v42_v4 = vld [vmem:[%s3061_s0 + $0x78] sm:$0xff]  ;;  %v39_v6 = vld [vmem:[%s3061_s0 + $0x60] sm:$0xff]  ;;  %v17_v36 = vshrl.u32 %v16_v17, 7 }
   0x3   :  { %v1952_v3 = vpack.c.bf16 %v40_v1, %v28_v0  ;;  %v1976_v8 = vpack.c.bf16 %v42_v4, %v30_v2  ;;  %v1954_v9 = vpack.c.bf16 %v39_v6, %v27_v5  ;;  %v29_v10 = vld [vmem:[%s3061_s0 + $0x10] sm:$0xff]  ;;  %v52_v12 = vld [vmem:[%s3061_s0 + $0xc8] sm:$0xff]  ;;  %v54_v15 = vld [vmem:[%s3061_s0 + $0xd8] sm:$0xff]  ;;  %v19_v2 = vand.u32 127, %v16_v17 }
   0x4   :  { %v41_v11 = vld [vmem:[%s3061_s0 + $0x70] sm:$0xff]  ;;  %v64_v14 = vld [vmem:[%s3061_s0 + $0x128] sm:$0xff]  ;;  %v66_v16 = vld [vmem:[%s3061_s0 + $0x138] sm:$0xff]  ;;  %v22_v53 = vadd.s32 1, %v17_v36 }
   0x5   :  { %1953 = vmatprep.subr.bf16.mxu0 %v1952_v3  ;;  %v1978_v13 = vpack.c.bf16 %v41_v11, %v29_v10  ;;  %1977 = vmatprep.subr.bf16.mxu1 %v1976_v8  ;;  %v1956_v18 = vpack.c.bf16 %v64_v14, %v52_v12  ;;  %v1980_v19 = vpack.c.bf16 %v66_v16, %v54_v15  ;;  %v51_v20 = vld [vmem:[%s3061_s0 + $0xc0] sm:$0xff]  ;;  %v53_v22 = vld [vmem:[%s3061_s0 + $0xd0] sm:$0xff]  ;;  %v76_v25 = vld [vmem:[%s3061_s0 + $0x188] sm:$0xff]  ;;  %v20_v3 = vmul.u32 49, %v17_v36 }
   0x6   :  { %1955 = vmatpush1.bf16.msra.mxu0 %v1954_v9  ;;  %v63_v21 = vld [vmem:[%s3061_s0 + $0x120] sm:$0xff]  ;;  %v65_v24 = vld [vmem:[%s3061_s0 + $0x130] sm:$0xff]  ;;  %v88_v26 = vld [vmem:[%s3061_s0 + $0x1e8] sm:$0xff]  ;;  %v23_v4 = vmul.u32 49, %v22_v53 }
   0x7   :  { %1979 = vmatpush1.bf16.msra.mxu1 %v1978_v13  ;;  %v1958_v23 = vpack.c.bf16 %v63_v21, %v51_v20  ;;  %1957 = vmatprep.subr.bf16.mxu0 %v1956_v18  ;;  %v1982_v27 = vpack.c.bf16 %v65_v24, %v53_v22  ;;  %v1960_v28 = vpack.c.bf16 %v88_v26, %v76_v25  ;;  %v78_v29 = vld [vmem:[%s3061_s0 + $0x198] sm:$0xff]  ;;  %v75_v31 = vld [vmem:[%s3061_s0 + $0x180] sm:$0xff]  ;;  %v77_v34 = vld [vmem:[%s3061_s0 + $0x190] sm:$0xff] }
   0x8   :  { %1981 = vmatprep.subr.bf16.mxu1 %v1980_v19  ;;  %v90_v30 = vld [vmem:[%s3061_s0 + $0x1f8] sm:$0xff]  ;;  %v87_v33 = vld [vmem:[%s3061_s0 + $0x1e0] sm:$0xff]  ;;  %v89_v35 = vld [vmem:[%s3061_s0 + $0x1f0] sm:$0xff]  ;;  %vm2386_vm0 = vcmp.ge.s32.totalorder %v19_v2, %v20_v3  ;;  %vm2390_vm1 = vcmp.lt.s32.totalorder %v19_v2, %v23_v4 }
   0x9   :  { %v1984_v32 = vpack.c.bf16 %v90_v30, %v78_v29  ;;  %v1962_v37 = vpack.c.bf16 %v87_v33, %v75_v31  ;;  %v100_v38 = vld [vmem:[%s3061_s0 + $0x248] sm:$0xff]  ;;  %v102_v40 = vld [vmem:[%s3061_s0 + $0x258] sm:$0xff]  ;;  %v1986_v41 = vpack.c.bf16 %v89_v35, %v77_v34  ;;  %v99_v44 = vld [vmem:[%s3061_s0 + $0x240] sm:$0xff] }
   0xa   :  { %1959 = vmatpush1.bf16.msra.mxu0 %v1958_v23  ;;  %v112_v39 = vld [vmem:[%s3061_s0 + $0x2a8] sm:$0xff]  ;;  %v114_v43 = vld [vmem:[%s3061_s0 + $0x2b8] sm:$0xff]  ;;  %v111_v45 = vld [vmem:[%s3061_s0 + $0x2a0] sm:$0xff] }
   0xb   :  { %1983 = vmatpush1.bf16.msra.mxu1 %v1982_v27  ;;  %1961 = vmatprep.subr.bf16.mxu0 %v1960_v28  ;;  %v1964_v42 = vpack.c.bf16 %v112_v39, %v100_v38  ;;  %v1988_v46 = vpack.c.bf16 %v114_v43, %v102_v40  ;;  %v101_v47 = vld [vmem:[%s3061_s0 + $0x250] sm:$0xff]  ;;  %v124_v49 = vld [vmem:[%s3061_s0 + $0x308] sm:$0xff]  ;;  %v126_v51 = vld [vmem:[%s3061_s0 + $0x318] sm:$0xff]  ;;  %v1966_v54 = vpack.c.bf16 %v111_v45, %v99_v44 }
   0xc   :  { %1985 = vmatprep.subr.bf16.mxu1 %v1984_v32  ;;  %v113_v48 = vld [vmem:[%s3061_s0 + $0x2b0] sm:$0xff]  ;;  %v136_v50 = vld [vmem:[%s3061_s0 + $0x368] sm:$0xff]  ;;  %v138_v52 = vld [vmem:[%s3061_s0 + $0x378] sm:$0xff] }
   0xd   :  { %v1990_v55 = vpack.c.bf16 %v113_v48, %v101_v47  ;;  %v1968_v56 = vpack.c.bf16 %v136_v50, %v124_v49  ;;  %v123_v57 = vld [vmem:[%s3061_s0 + $0x300] sm:$0xff]  ;;  %v125_v59 = vld [vmem:[%s3061_s0 + $0x310] sm:$0xff]  ;;  %v1992_v60 = vpack.c.bf16 %v138_v52, %v126_v51  ;;  %v148_v62 = vld [vmem:[%s3061_s0 + $0x3c8] sm:$0xff] }
   0xe   :  { %1963 = vmatpush1.bf16.msra.mxu0 %v1962_v37  ;;  %v135_v58 = vld [vmem:[%s3061_s0 + $0x360] sm:$0xff]  ;;  %v137_v61 = vld [vmem:[%s3061_s0 + $0x370] sm:$0xff]  ;;  %v160_v63 = vld [vmem:[%s3061_s0 + $0x428] sm:$0xff] }
   0xf   :  { %1987 = vmatpush1.bf16.msra.mxu1 %v1986_v41  ;;  %1965 = vmatprep.subr.bf16.mxu0 %v1964_v42  ;;  %v150_v0 = vld [vmem:[%s3061_s0 + $0x3d8] sm:$0xff]  ;;  %v1970_v5 = vpack.c.bf16 %v135_v58, %v123_v57  ;;  %v1994_v6 = vpack.c.bf16 %v137_v61, %v125_v59  ;;  %v1972_v8 = vpack.c.bf16 %v160_v63, %v148_v62  ;;  %v147_v9 = vld [vmem:[%s3061_s0 + $0x3c0] sm:$0xff]  ;;  %v149_v12 = vld [vmem:[%s3061_s0 + $0x3d0] sm:$0xff] }
  0x10   :  { %1989 = vmatprep.subr.bf16.mxu1 %v1988_v46  ;;  %v162_v1 = vld [vmem:[%s3061_s0 + $0x438] sm:$0xff]  ;;  %v159_v10 = vld [vmem:[%s3061_s0 + $0x420] sm:$0xff]  ;;  %v161_v13 = vld [vmem:[%s3061_s0 + $0x430] sm:$0xff] }
  0x11   :  { %v1996_v11 = vpack.c.bf16 %v162_v1, %v150_v0  ;;  %v1974_v16 = vpack.c.bf16 %v159_v10, %v147_v9  ;;  %v1998_v17 = vpack.c.bf16 %v161_v13, %v149_v12  ;;  %v172_v18 = vld [vmem:[%s3061_s0 + $0x488] sm:$0x3]  ;;  %v174_v19 = vld [vmem:[%s3061_s0 + $0x498] sm:$0x3]  ;;  %vm25_vm3 = vmand %vm2386_vm0, %vm2390_vm1 }
  0x12   :  { %1967 = vmatpush1.bf16.msra.mxu0 %v1966_v54  ;;  %v32_v20 = vld [vmem:[%s3061_s0 + $0x28] sm:$0xff]  ;;  %v171_v21 = vld [vmem:[%s3061_s0 + $0x480] sm:$0x3]  ;;  %v34_v23 = vld [vmem:[%s3061_s0 + $0x38] sm:$0xff]  ;;  %v2448_v32 = vsel %vm25_vm3, 1.0, %v2218_v7 }
  0x13   :  { %1991 = vmatpush1.bf16.msra.mxu1 %v1990_v55  ;;  %1969 = vmatprep.subr.bf16.mxu0 %v1968_v56  ;;  %v44_v22 = vld [vmem:[%s3061_s0 + $0x88] sm:$0xff]  ;;  %v46_v24 = vld [vmem:[%s3061_s0 + $0x98] sm:$0xff]  ;;  %v31_v25 = vld [vmem:[%s3061_s0 + $0x20] sm:$0xff] }
  0x14   :  { %1993 = vmatprep.subr.bf16.mxu1 %v1992_v60  ;;  %v43_v26 = vld [vmem:[%s3061_s0 + $0x80] sm:$0xff]  ;;  %v33_v27 = vld [vmem:[%s3061_s0 + $0x30] sm:$0xff]  ;;  %v56_v29 = vld [vmem:[%s3061_s0 + $0xe8] sm:$0xff]  ;;  %v2000_v33 = vpack.c.bf16 %v44_v22, %v32_v20  ;;  %v2024_v36 = vpack.c.bf16 %v46_v24, %v34_v23 }
  0x15   :  { %v45_v28 = vld [vmem:[%s3061_s0 + $0x90] sm:$0xff]  ;;  %v68_v30 = vld [vmem:[%s3061_s0 + $0x148] sm:$0xff]  ;;  %v58_v34 = vld [vmem:[%s3061_s0 + $0xf8] sm:$0xff]  ;;  %v2002_v37 = vpack.c.bf16 %v43_v26, %v31_v25 }
  0x16   :  { %1971 = vmatpush1.bf16.msra.mxu0 %v1970_v5  ;;  %v173_v31 = vld [vmem:[%s3061_s0 + $0x490] sm:$0x3]  ;;  %v70_v35 = vld [vmem:[%s3061_s0 + $0x158] sm:$0xff]  ;;  %v2026_v38 = vpack.c.bf16 %v45_v28, %v33_v27  ;;  %v2004_v39 = vpack.c.bf16 %v68_v30, %v56_v29  ;;  %v55_v40 = vld [vmem:[%s3061_s0 + $0xe0] sm:$0xff] }
  0x17   :  { %1995 = vmatpush1.bf16.msra.mxu1 %v1994_v6  ;;  %1973 = vmatprep.subr.bf16.mxu0 %v1972_v8  ;;  %v67_v41 = vld [vmem:[%s3061_s0 + $0x140] sm:$0xff]  ;;  %v57_v42 = vld [vmem:[%s3061_s0 + $0xf0] sm:$0xff]  ;;  %v2028_v43 = vpack.c.bf16 %v70_v35, %v58_v34  ;;  %v80_v45 = vld [vmem:[%s3061_s0 + $0x1a8] sm:$0xff] }
  0x18   :  { %1997 = vmatprep.subr.bf16.mxu1 %v1996_v11  ;;  %v69_v44 = vld [vmem:[%s3061_s0 + $0x150] sm:$0xff]  ;;  %v92_v46 = vld [vmem:[%s3061_s0 + $0x208] sm:$0xff]  ;;  %v82_v47 = vld [vmem:[%s3061_s0 + $0x1b8] sm:$0xff]  ;;  %v2006_v49 = vpack.c.bf16 %v67_v41, %v55_v40 }
  0x19   :  { %v94_v48 = vld [vmem:[%s3061_s0 + $0x218] sm:$0xff]  ;;  %v2030_v50 = vpack.c.bf16 %v69_v44, %v57_v42  ;;  %v2008_v51 = vpack.c.bf16 %v92_v46, %v80_v45  ;;  %v79_v52 = vld [vmem:[%s3061_s0 + $0x1a0] sm:$0xff]  ;;  %v81_v54 = vld [vmem:[%s3061_s0 + $0x1b0] sm:$0xff] }
  0x1a   :  { %1975 = vmatpush1.bf16.msra.mxu0 %v1974_v16  ;;  %v91_v53 = vld [vmem:[%s3061_s0 + $0x200] sm:$0xff]  ;;  %v2032_v55 = vpack.c.bf16 %v94_v48, %v82_v47  ;;  %v93_v56 = vld [vmem:[%s3061_s0 + $0x210] sm:$0xff]  ;;  %v104_v57 = vld [vmem:[%s3061_s0 + $0x268] sm:$0xff] }
  0x1b   :  { %1999 = vmatpush1.bf16.msra.mxu1 %v1998_v17  ;;  %1705 = vmatprep.subr.msk.mxu0 %vm187_vm2, %v172_v18  ;;  %v116_v58 = vld [vmem:[%s3061_s0 + $0x2c8] sm:$0xff]  ;;  %v106_v59 = vld [vmem:[%s3061_s0 + $0x278] sm:$0xff]  ;;  %v2010_v61 = vpack.c.bf16 %v91_v53, %v79_v52  ;;  %v2034_v62 = vpack.c.bf16 %v93_v56, %v81_v54  ;;  %v103_v0 = vld [vmem:[%s3061_s0 + $0x260] sm:$0xff] }
  0x1c   :  { %1708 = vmatprep.subr.msk.mxu1 %vm187_vm2, %v174_v19  ;;  %v118_v60 = vld [vmem:[%s3061_s0 + $0x2d8] sm:$0xff]  ;;  %v2012_v63 = vpack.c.bf16 %v116_v58, %v104_v57  ;;  %v115_v1 = vld [vmem:[%s3061_s0 + $0x2c0] sm:$0xff]  ;;  %v105_v2 = vld [vmem:[%s3061_s0 + $0x270] sm:$0xff] }
  0x1d   :  { %v2036_v3 = vpack.c.bf16 %v118_v60, %v106_v59  ;;  %v117_v4 = vld [vmem:[%s3061_s0 + $0x2d0] sm:$0xff]  ;;  %v128_v5 = vld [vmem:[%s3061_s0 + $0x328] sm:$0xff]  ;;  %v130_v8 = vld [vmem:[%s3061_s0 + $0x338] sm:$0xff]  ;;  %v2014_v10 = vpack.c.bf16 %v115_v1, %v103_v0 }
  0x1e   :  { %1706 = vmatpush1.msk.msra.mxu0 %vm187_vm2, %v171_v21  ;;  %v140_v6 = vld [vmem:[%s3061_s0 + $0x388] sm:$0xff]  ;;  %v142_v9 = vld [vmem:[%s3061_s0 + $0x398] sm:$0xff]  ;;  %v2038_v11 = vpack.c.bf16 %v117_v4, %v105_v2  ;;  %v127_v13 = vld [vmem:[%s3061_s0 + $0x320] sm:$0xff] }
  0x1f   :  { %1709 = vmatpush1.msk.msra.mxu1 %vm187_vm2, %v173_v31  ;;  %1707 = vmatmul.mubr.msk.f32.vlgmr.msra.gmra.mrb[0].mxu0 %vm183_vm4, %v2448_v32  ;;  %v2016_v12 = vpack.c.bf16 %v140_v6, %v128_v5  ;;  %v139_v14 = vld [vmem:[%s3061_s0 + $0x380] sm:$0xff]  ;;  %v129_v15 = vld [vmem:[%s3061_s0 + $0x330] sm:$0xff]  ;;  %v2040_v16 = vpack.c.bf16 %v142_v9, %v130_v8  ;;  %v152_v18 = vld [vmem:[%s3061_s0 + $0x3e8] sm:$0xff] }
  0x20   :  { %1710 = vmatmul.mubr.msk.f32.vlgmr.msra.gmra.mrb[0].mxu1 %vm183_vm4, %v2448_v32  ;;  %2001 = vmatprep.subr.bf16.mxu0 %v2000_v33  ;;  %v141_v17 = vld [vmem:[%s3061_s0 + $0x390] sm:$0xff]  ;;  %v164_v19 = vld [vmem:[%s3061_s0 + $0x448] sm:$0xff]  ;;  %v154_v20 = vld [vmem:[%s3061_s0 + $0x3f8] sm:$0xff]  ;;  %v2018_v22 = vpack.c.bf16 %v139_v14, %v127_v13 }
  0x21   :  { %2025 = vmatprep.subr.bf16.mxu1 %v2024_v36  ;;  %2003 = vmatpush1.bf16.msra.mxu0 %v2002_v37  ;;  %v166_v21 = vld [vmem:[%s3061_s0 + $0x458] sm:$0xff]  ;;  %v2042_v23 = vpack.c.bf16 %v141_v17, %v129_v15  ;;  %v2020_v24 = vpack.c.bf16 %v164_v19, %v152_v18  ;;  %v151_v25 = vld [vmem:[%s3061_s0 + $0x3e0] sm:$0xff]  ;;  %v153_v28 = vld [vmem:[%s3061_s0 + $0x3f0] sm:$0xff] }
  0x22   :  { %2027 = vmatpush1.bf16.msra.mxu1 %v2026_v38  ;;  %2005 = vmatprep.subr.bf16.mxu0 %v2004_v39  ;;  %v163_v26 = vld [vmem:[%s3061_s0 + $0x440] sm:$0xff]  ;;  %v2044_v27 = vpack.c.bf16 %v166_v21, %v154_v20  ;;  %v165_v29 = vld [vmem:[%s3061_s0 + $0x450] sm:$0xff]  ;;  %v176_v33 = vld [vmem:[%s3061_s0 + $0x4a8] sm:$0x3] }
  0x23   :  { %2029 = vmatprep.subr.bf16.mxu1 %v2028_v43  ;;  %430 = vmatprep.mubr.f32.mxu0 %v2218_v7  ;;  %v2022_v30 = vpack.c.bf16 %v163_v26, %v151_v25  ;;  %v2046_v31 = vpack.c.bf16 %v165_v29, %v153_v28  ;;  %v178_v34 = vld [vmem:[%s3061_s0 + $0x4b8] sm:$0x3]  ;;  %v36_v35 = vld [vmem:[%s3061_s0 + $0x48] sm:$0xff]  ;;  %v35_v37 = vld [vmem:[%s3061_s0 + $0x40] sm:$0xff] }
  0x24   :  { %501 = vmatprep.mubr.f32.mxu1 %v2218_v7  ;;  %v48_v36 = vld [vmem:[%s3061_s0 + $0xa8] sm:$0xff]  ;;  %v47_v38 = vld [vmem:[%s3061_s0 + $0xa0] sm:$0xff]  ;;  %v38_v40 = vld [vmem:[%s3061_s0 + $0x58] sm:$0xff] }
  0x25   :  { %2007 = vmatpush1.bf16.msra.mxu0 %v2006_v49  ;;  %v175_v39 = vld [vmem:[%s3061_s0 + $0x4a0] sm:$0x3]  ;;  %v50_v41 = vld [vmem:[%s3061_s0 + $0xb8] sm:$0xff]  ;;  %v37_v42 = vld [vmem:[%s3061_s0 + $0x50] sm:$0xff]  ;;  %v2048_v48 = vpack.c.bf16 %v48_v36, %v36_v35  ;;  %v2050_v52 = vpack.c.bf16 %v47_v38, %v35_v37 }
  0x26   :  { %2031 = vmatpush1.bf16.msra.mxu1 %v2030_v50  ;;  %2009 = vmatprep.subr.bf16.mxu0 %v2008_v51  ;;  %v177_v43 = vld [vmem:[%s3061_s0 + $0x4b0] sm:$0x3]  ;;  %v60_v45 = vld [vmem:[%s3061_s0 + $0x108] sm:$0xff]  ;;  %v62_v47 = vld [vmem:[%s3061_s0 + $0x118] sm:$0xff]  ;;  %v2072_v53 = vpack.c.bf16 %v50_v41, %v38_v40 }
  0x27   :  { %2033 = vmatprep.subr.bf16.mxu1 %v2032_v55  ;;  %v49_v44 = vld [vmem:[%s3061_s0 + $0xb0] sm:$0xff]  ;;  %v72_v46 = vld [vmem:[%s3061_s0 + $0x168] sm:$0xff]  ;;  %v59_v49 = vld [vmem:[%s3061_s0 + $0x100] sm:$0xff] }
  0x28   :  { %v71_v50 = vld [vmem:[%s3061_s0 + $0x160] sm:$0xff]  ;;  %v74_v51 = vld [vmem:[%s3061_s0 + $0x178] sm:$0xff]  ;;  %v61_v54 = vld [vmem:[%s3061_s0 + $0x110] sm:$0xff]  ;;  %v2074_v57 = vpack.c.bf16 %v49_v44, %v37_v42  ;;  %v2052_v58 = vpack.c.bf16 %v72_v46, %v60_v45 }
  0x29   :  { %2011 = vmatpush1.bf16.msra.mxu0 %v2010_v61  ;;  %v73_v55 = vld [vmem:[%s3061_s0 + $0x170] sm:$0xff]  ;;  %v84_v56 = vld [vmem:[%s3061_s0 + $0x1c8] sm:$0xff]  ;;  %v2076_v60 = vpack.c.bf16 %v74_v51, %v62_v47  ;;  %v86_v61 = vld [vmem:[%s3061_s0 + $0x1d8] sm:$0xff]  ;;  %v2054_v1 = vpack.c.bf16 %v71_v50, %v59_v49 }
  0x2a   :  { %2035 = vmatpush1.bf16.msra.mxu1 %v2034_v62  ;;  %2013 = vmatprep.subr.bf16.mxu0 %v2012_v63  ;;  %v96_v59 = vld [vmem:[%s3061_s0 + $0x228] sm:$0xff]  ;;  %v83_v62 = vld [vmem:[%s3061_s0 + $0x1c0] sm:$0xff]  ;;  %v98_v0 = vld [vmem:[%s3061_s0 + $0x238] sm:$0xff]  ;;  %v2078_v5 = vpack.c.bf16 %v73_v55, %v61_v54 }
  0x2b   :  { %2037 = vmatprep.subr.bf16.mxu1 %v2036_v3  ;;  %v95_v63 = vld [vmem:[%s3061_s0 + $0x220] sm:$0xff]  ;;  %v85_v2 = vld [vmem:[%s3061_s0 + $0x1d0] sm:$0xff]  ;;  %v108_v4 = vld [vmem:[%s3061_s0 + $0x288] sm:$0xff]  ;;  %v2056_v6 = vpack.c.bf16 %v96_v59, %v84_v56  ;;  %v2080_v9 = vpack.c.bf16 %v98_v0, %v86_v61 }
  0x2c   :  { %v97_v3 = vld [vmem:[%s3061_s0 + $0x230] sm:$0xff]  ;;  %v120_v8 = vld [vmem:[%s3061_s0 + $0x2e8] sm:$0xff]  ;;  %v122_v13 = vld [vmem:[%s3061_s0 + $0x2f8] sm:$0xff]  ;;  %v2058_v14 = vpack.c.bf16 %v95_v63, %v83_v62 }
  0x2d   :  { %2015 = vmatpush1.bf16.msra.mxu0 %v2014_v10  ;;  %v110_v10 = vld [vmem:[%s3061_s0 + $0x298] sm:$0xff]  ;;  %v109_v15 = vld [vmem:[%s3061_s0 + $0x290] sm:$0xff]  ;;  %v132_v17 = vld [vmem:[%s3061_s0 + $0x348] sm:$0xff]  ;;  %v2082_v18 = vpack.c.bf16 %v97_v3, %v85_v2  ;;  %v2060_v19 = vpack.c.bf16 %v120_v8, %v108_v4 }
  0x2e   :  { %2039 = vmatpush1.bf16.msra.mxu1 %v2038_v11  ;;  %2017 = vmatprep.subr.bf16.mxu0 %v2016_v12  ;;  %v107_v11 = vld [vmem:[%s3061_s0 + $0x280] sm:$0xff]  ;;  %v2084_v20 = vpack.c.bf16 %v122_v13, %v110_v10  ;;  %v134_v21 = vld [vmem:[%s3061_s0 + $0x358] sm:$0xff]  ;;  %v133_v26 = vld [vmem:[%s3061_s0 + $0x350] sm:$0xff] }
  0x2f   :  { %2041 = vmatprep.subr.bf16.mxu1 %v2040_v16  ;;  %v119_v12 = vld [vmem:[%s3061_s0 + $0x2e0] sm:$0xff]  ;;  %v121_v16 = vld [vmem:[%s3061_s0 + $0x2f0] sm:$0xff]  ;;  %v156_v28 = vld [vmem:[%s3061_s0 + $0x408] sm:$0xff] }
  0x30   :  { %v2062_v25 = vpack.c.bf16 %v119_v12, %v107_v11  ;;  %v2086_v29 = vpack.c.bf16 %v121_v16, %v109_v15  ;;  %v155_v35 = vld [vmem:[%s3061_s0 + $0x400] sm:$0xff]  ;;  %v170_v36 = vld [vmem:[%s3061_s0 + $0x478] sm:$0xff]  ;;  %v157_v41 = vld [vmem:[%s3061_s0 + $0x410] sm:$0xff] }
  0x31   :  { %2019 = vmatpush1.bf16.msra.mxu0 %v2018_v22  ;;  %v131_v22 = vld [vmem:[%s3061_s0 + $0x340] sm:$0xff]  ;;  %v180_v46 = vld [vmem:[%s3061_s0 + $0x4c8] sm:$0x3]  ;;  %v181_v49 = vld [vmem:[%s3061_s0 + $0x4d0] sm:$0x3] }
  0x32   :  { %2043 = vmatpush1.bf16.msra.mxu1 %v2042_v23  ;;  %2021 = vmatprep.subr.bf16.mxu0 %v2020_v24  ;;  %v143_v23 = vld [vmem:[%s3061_s0 + $0x3a0] sm:$0xff]  ;;  %v146_v24 = vld [vmem:[%s3061_s0 + $0x3b8] sm:$0xff]  ;;  %v2102_v54 = vld [vmem:[%s3062_s1 + $0x48] sm:$0xff]  }
  0x33   :  { %2045 = vmatprep.subr.bf16.mxu1 %v2044_v27  ;;  %v145_v27 = vld [vmem:[%s3061_s0 + $0x3b0] sm:$0xff]  ;;  %v2066_v37 = vpack.c.bf16 %v143_v23, %v131_v22  ;;  %v167_v38 = vld [vmem:[%s3061_s0 + $0x460] sm:$0xff]  ;;  %v2103_v55 = vld [vmem:[%s3062_s1 + $0xc8] sm:$0xff]  }
  0x34   :  { %v2070_v44 = vpack.c.bf16 %v167_v38, %v155_v35  ;;  %v179_v47 = vld [vmem:[%s3061_s0 + $0x4c0] sm:$0x3]  ;;  %v2104_v56 = vld [vmem:[%s3062_s1 + $0x8] sm:$0xff]   ;;  %v2107_v59 = vld [vmem:[%s3062_s1 + $0xd0] sm:$0xff]  }
  0x35   :  { %2023 = vmatpush1.bf16.msra.mxu0 %v2022_v30  ;;  %v2098_v50 = vld [vmem:[%s3062_s1 + $0x40] sm:$0xff]   ;;  %v2110_v61 = vld [vmem:[%s3062_s1 + $0x58] sm:$0xff]   ;;  %v2120_v8 = vld [vmem:[%s3062_s1 + $0x28] sm:$0xff]  }
  0x36   :  { %2047 = vmatpush1.bf16.msra.mxu1 %v2046_v31  ;;  %1711 = vmatprep.subr.msk.mxu0 %vm187_vm2, %v176_v33  ;;  %v168_v31 = vld [vmem:[%s3061_s0 + $0x468] sm:$0xff]  ;;  %v2088_v33 = vpack.c.bf16 %v146_v24, %v134_v21  ;;  %v2099_v51 = vld [vmem:[%s3062_s1 + $0xc0] sm:$0xff]   ;;  %v2111_v62 = vld [vmem:[%s3062_s1 + $0xd8] sm:$0xff]  }
  0x37   :  { %1714 = vmatprep.subr.msk.mxu1 %vm187_vm2, %v178_v34  ;;  %v158_v34 = vld [vmem:[%s3061_s0 + $0x418] sm:$0xff]  ;;  %v2068_v40 = vpack.c.bf16 %v168_v31, %v156_v28  ;;  %v2115_v2 = vld [vmem:[%s3062_s1 + $0xe0] sm:$0xff]   ;;  %v2122_v10 = vld [vmem:[%s3062_s1 + $0x70] sm:$0xff]  }
  0x38   :  { %v2092_v42 = vpack.c.bf16 %v170_v36, %v158_v34  ;;  %v2112_v63 = vld [vmem:[%s3062_s1 + $0x18] sm:$0xff]   ;;  %v2116_v3 = vld [vmem:[%s3062_s1 + $0x20] sm:$0xff]   ;;  %v2123_v11 = vld [vmem:[%s3062_s1 + $0xf0] sm:$0xff]  }
  0x39   :  { %1712 = vmatpush1.msk.msra.mxu0 %vm187_vm2, %v175_v39  ;;  %v2090_v39 = vpack.c.bf16 %v145_v27, %v133_v26  ;;  %v2113_v0 = vld [vmem:[%s3062_s1 + $0x98] sm:$0xff]   ;;  %v2117_v4 = vld [vmem:[%s3062_s1 + $0xa0] sm:$0xff]   ;;  %v2124_v12 = vld [vmem:[%s3062_s1 + $0x30] sm:$0xff]  }
  0x3a   :  { %1715 = vmatpush1.msk.msra.mxu1 %vm187_vm2, %v177_v43  ;;  %1713 = vmatmul.mubr.msk.f32.vlgmr.msra.gmra.mrb[2].mxu0 %vm183_vm4, %v2448_v32  ;;  %v169_v43 = vld [vmem:[%s3061_s0 + $0x470] sm:$0xff]  ;;  %v2127_v15 = vld [vmem:[%s3062_s1 + $0xf8] sm:$0xff]  }
  0x3b   :  { %1716 = vmatmul.mubr.msk.f32.vlgmr.msra.gmra.mrb[2].mxu1 %vm183_vm4, %v2448_v32  ;;  %2049 = vmatprep.subr.bf16.mxu0 %v2048_v48  ;;  %v2094_v45 = vpack.c.bf16 %v169_v43, %v157_v41  ;;  %v182_v48 = vld [vmem:[%s3061_s0 + $0x4d8] sm:$0x3]  ;;  %v2125_v13 = vld [vmem:[%s3062_s1 + $0xb0] sm:$0xff]  }
  0x3c   :  { %2051 = vmatpush1.bf16.msra.mxu0 %v2050_v52  ;;  %2073 = vmatprep.subr.bf16.mxu1 %v2072_v53  ;;  %v2100_v52 = vld [vmem:[%s3062_s1] sm:$0xff]   ;;  %v2128_v16 = vld [vmem:[%s3062_s1 + $0x38] sm:$0xff]  }
  0x3d   :  { %2075 = vmatpush1.bf16.msra.mxu1 %v2074_v57  ;;  %2053 = vmatprep.subr.bf16.mxu0 %v2052_v58  ;;  %v2101_v53 = vld [vmem:[%s3062_s1 + $0x80] sm:$0xff]   ;;  %v2105_v57 = vld [vmem:[%s3062_s1 + $0x88] sm:$0xff]   ;;  %v2106_v58 = vld [vmem:[%s3062_s1 + $0x50] sm:$0xff]  }
  0x3e   :  { %2077 = vmatprep.subr.bf16.mxu1 %v2076_v60  ;;  %572 = vmatprep.mubr.f32.mxu0 %v2218_v7  ;;  %v2109_v60 = vld [vmem:[%s3062_s1 + $0x90] sm:$0xff]  }
  0x3f   :  { %643 = vmatprep.mubr.f32.mxu1 %v2218_v7  ;;  %v144_v7 = vld [vmem:[%s3061_s0 + $0x3a8] sm:$0xff] }
  0x40   :  { %2055 = vmatpush1.bf16.msra.mxu0 %v2054_v1  ;;  %v2064_v30 = vpack.c.bf16 %v144_v7, %v132_v17  ;;  %v2114_v1 = vld [vmem:[%s3062_s1 + $0x60] sm:$0xff]   ;;  %v2129_v17 = vld [vmem:[%s3062_s1 + $0xb8] sm:$0xff]  }
  0x41   :  { %2079 = vmatpush1.bf16.msra.mxu1 %v2078_v5  ;;  %2057 = vmatprep.subr.bf16.mxu0 %v2056_v6  ;;  %v2118_v5 = vld [vmem:[%s3062_s1 + $0x68] sm:$0xff]  }
  0x42   :  { %2081 = vmatprep.subr.bf16.mxu1 %v2080_v9  ;;  %v2119_v6 = vld [vmem:[%s3062_s1 + $0xe8] sm:$0xff]  }
  0x43   :  { %v2121_v9 = vld [vmem:[%s3062_s1 + $0xa8] sm:$0xff]  }
  0x44   :  { %2059 = vmatpush1.bf16.msra.mxu0 %v2058_v14  ;;  %v2126_v14 = vld [vmem:[%s3062_s1 + $0x78] sm:$0xff]  }
  0x45   :  { %2083 = vmatpush1.bf16.msra.mxu1 %v2082_v18  ;;  %2061 = vmatprep.subr.bf16.mxu0 %v2060_v19  ;;  %v2130_v18 = vld [vmem:[%s3062_s1 + $0x140] sm:$0xff]  }
  0x46   :  { %2085 = vmatprep.subr.bf16.mxu1 %v2084_v20  ;;  %v2131_v19 = vld [vmem:[%s3062_s1 + $0x1c0] sm:$0xff]  }
  0x48   :  { %2063 = vmatpush1.bf16.msra.mxu0 %v2062_v25 }
  0x49   :  { %2087 = vmatpush1.bf16.msra.mxu1 %v2086_v29  ;;  %2065 = vmatprep.subr.bf16.mxu0 %v2064_v30 }
  0x4a   :  { %2089 = vmatprep.subr.bf16.mxu1 %v2088_v33 }
  0x4c   :  { %2067 = vmatpush1.bf16.msra.mxu0 %v2066_v37 }
  0x4d   :  { %2091 = vmatpush1.bf16.msra.mxu1 %v2090_v39  ;;  %2069 = vmatprep.subr.bf16.mxu0 %v2068_v40 }
  0x4e   :  { %2093 = vmatprep.subr.bf16.mxu1 %v2092_v42 }
  0x50   :  { %2071 = vmatpush1.bf16.msra.mxu0 %v2070_v44 }
  0x51   :  { %2095 = vmatpush1.bf16.msra.mxu1 %v2094_v45  ;;  %1717 = vmatprep.subr.msk.mxu0 %vm187_vm2, %v180_v46 }
  0x52   :  { %1720 = vmatprep.subr.msk.mxu1 %vm187_vm2, %v182_v48 }
  0x54   :  { %1718 = vmatpush1.msk.msra.mxu0 %vm187_vm2, %v179_v47 }
  0x55   :  { %1719 = vmatmul.mubr.msk.f32.vlgmr.msra.gmra.mrb[4].mxu0 %vm183_vm4, %v2448_v32  ;;  %1721 = vmatpush1.msk.msra.mxu1 %vm187_vm2, %v181_v49 }
  0x56   :  { %1722 = vmatmul.mubr.msk.f32.vlgmr.msra.gmra.mrb[4].mxu1 %vm183_vm4, %v2448_v32  ;;  %1820 = vmatprep.subr.bf16.mxu0 %v2098_v50  ;;  %v2108_v32 = vld [vmem:[%s3062_s1 + $0x10] sm:$0xff]  }
  0x57   :  { %1842 = vmatprep.subr.bf16.mxu1 %v2099_v51  ;;  %1821 = vmatpush3.bf16.msra.mxu0 %v2100_v52 }
  0x58   :  { %1843 = vmatpush3.bf16.msra.mxu1 %v2101_v53  ;;  %1822 = vmatprep.subr.bf16.mxu0 %v2102_v54 }
  0x59   :  { %1844 = vmatprep.subr.bf16.mxu1 %v2103_v55 }
  0x5b   :  { %1823 = vmatpush3.bf16.msra.mxu0 %v2104_v56 }
  0x5c   :  { %1845 = vmatpush3.bf16.msra.mxu1 %v2105_v57  ;;  %1824 = vmatprep.subr.bf16.mxu0 %v2106_v58 }
  0x5d   :  { %1846 = vmatprep.subr.bf16.mxu1 %v2107_v59 }
  0x5f   :  { %1825 = vmatpush3.bf16.msra.mxu0 %v2108_v32 }
  0x60   :  { %1847 = vmatpush3.bf16.msra.mxu1 %v2109_v60  ;;  %1826 = vmatprep.subr.bf16.mxu0 %v2110_v61 }
  0x61   :  { %1848 = vmatprep.subr.bf16.mxu1 %v2111_v62 }
  0x63   :  { %1827 = vmatpush3.bf16.msra.mxu0 %v2112_v63 }
  0x64   :  { %1849 = vmatpush3.bf16.msra.mxu1 %v2113_v0  ;;  %1828 = vmatprep.subr.bf16.mxu0 %v2114_v1 }
  0x65   :  { %1850 = vmatprep.subr.bf16.mxu1 %v2115_v2 }
  0x67   :  { %1829 = vmatpush3.bf16.msra.mxu0 %v2116_v3 }
  0x68   :  { %1851 = vmatpush3.bf16.msra.mxu1 %v2117_v4  ;;  %1830 = vmatprep.subr.bf16.mxu0 %v2118_v5 }
  0x69   :  { %1852 = vmatprep.subr.bf16.mxu1 %v2119_v6 }
  0x6b   :  { %1831 = vmatpush3.bf16.msra.mxu0 %v2120_v8 }
  0x6c   :  { %1853 = vmatpush3.bf16.msra.mxu1 %v2121_v9  ;;  %1832 = vmatprep.subr.bf16.mxu0 %v2122_v10 }
  0x6d   :  { %1854 = vmatprep.subr.bf16.mxu1 %v2123_v11 }
  0x6f   :  { %1833 = vmatpush3.bf16.msra.mxu0 %v2124_v12 }
  0x70   :  { %1855 = vmatpush3.bf16.msra.mxu1 %v2125_v13  ;;  %1834 = vmatprep.subr.bf16.mxu0 %v2126_v14 }
  0x71   :  { %1856 = vmatprep.subr.bf16.mxu1 %v2127_v15 }
  0x73   :  { %1835 = vmatpush3.bf16.msra.mxu0 %v2128_v16 }
  0x74   :  { %1857 = vmatpush3.bf16.msra.mxu1 %v2129_v17  ;;  %1864 = vmatprep.subr.bf16.mxu0 %v2130_v18 }
  0x75   :  { %1886 = vmatprep.subr.bf16.mxu1 %v2131_v19 }
  0x76   :  { %8 = vsyncpa [#allocation3], 0  ;;  %v2132_v29 = vld [vmem:[%s3062_s1 + $0x100] sm:$0xff]   ;;  %v2134_v34 = vld [vmem:[%s3062_s1 + $0x148] sm:$0xff]   ;;  %vm1689_vm5 = vcmask 730112  }
  0x77   :  { %v2133_v33 = vld [vmem:[%s3062_s1 + $0x180] sm:$0xff]   ;;  %v2135_v35 = vld [vmem:[%s3062_s1 + $0x1c8] sm:$0xff]   ;;  %v2138_v38 = vld [vmem:[%s3062_s1 + $0x150] sm:$0xff]  }
  0x78   :  { %v2136_v36 = vld [vmem:[%s3062_s1 + $0x108] sm:$0xff]   ;;  %v2139_v39 = vld [vmem:[%s3062_s1 + $0x1d0] sm:$0xff]   ;;  %v2142_v42 = vld [vmem:[%s3062_s1 + $0x158] sm:$0xff]  }
  0x79   :  { %v2137_v37 = vld [vmem:[%s3062_s1 + $0x188] sm:$0xff]   ;;  %v2140_v40 = vld [vmem:[%s3062_s1 + $0x110] sm:$0xff]   ;;  %v2143_v43 = vld [vmem:[%s3062_s1 + $0x1d8] sm:$0xff]  }
  0x7a   :  { %v2141_v41 = vld [vmem:[%s3062_s1 + $0x190] sm:$0xff]   ;;  %v2144_v44 = vld [vmem:[%s3062_s1 + $0x118] sm:$0xff]   ;;  %v2146_v46 = vld [vmem:[%s3062_s1 + $0x160] sm:$0xff]  }
  0x7b   :  { %v2145_v45 = vld [vmem:[%s3062_s1 + $0x198] sm:$0xff]   ;;  %v2147_v47 = vld [vmem:[%s3062_s1 + $0x1e0] sm:$0xff]   ;;  %v2150_v50 = vld [vmem:[%s3062_s1 + $0x168] sm:$0xff]  }
  0x7c   :  { %v2148_v48 = vld [vmem:[%s3062_s1 + $0x120] sm:$0xff]   ;;  %v2151_v51 = vld [vmem:[%s3062_s1 + $0x1e8] sm:$0xff]   ;;  %v2154_v54 = vld [vmem:[%s3062_s1 + $0x170] sm:$0xff]  }
  0x7d   :  { %v2149_v49 = vld [vmem:[%s3062_s1 + $0x1a0] sm:$0xff]   ;;  %v2152_v52 = vld [vmem:[%s3062_s1 + $0x128] sm:$0xff]   ;;  %v2155_v55 = vld [vmem:[%s3062_s1 + $0x1f0] sm:$0xff]  }
  0x7e   :  { %v2153_v53 = vld [vmem:[%s3062_s1 + $0x1a8] sm:$0xff]   ;;  %v2156_v58 = vld [vmem:[%s3062_s1 + $0x130] sm:$0xff]   ;;  %v2158_v62 = vld [vmem:[%s3062_s1 + $0x178] sm:$0xff]  }
  0x7f   :  { %v2157_v32 = vld [vmem:[%s3062_s1 + $0x1b0] sm:$0xff]   ;;  %v2159_v0 = vld [vmem:[%s3062_s1 + $0x1f8] sm:$0xff]   ;;  %v2162_v8 = vld [vmem:[%s3062_s1 + $0x240] sm:$0xff]  }
  0x80   :  { %v2160_v5 = vld [vmem:[%s3062_s1 + $0x138] sm:$0xff]   ;;  %v2163_v9 = vld [vmem:[%s3062_s1 + $0x2c0] sm:$0xff]   ;;  %v2166_v14 = vld [vmem:[%s3062_s1 + $0x248] sm:$0xff]  }
  0x81   :  { %v2161_v6 = vld [vmem:[%s3062_s1 + $0x1b8] sm:$0xff]   ;;  %v2164_v12 = vld [vmem:[%s3062_s1 + $0x200] sm:$0xff]   ;;  %v2167_v15 = vld [vmem:[%s3062_s1 + $0x2c8] sm:$0xff]  }
  0x82   :  { %v2165_v13 = vld [vmem:[%s3062_s1 + $0x280] sm:$0xff]   ;;  %v2168_v16 = vld [vmem:[%s3062_s1 + $0x208] sm:$0xff]   ;;  %v2170_v18 = vld [vmem:[%s3062_s1 + $0x250] sm:$0xff]  }
  0x83   :  { %v2169_v17 = vld [vmem:[%s3062_s1 + $0x288] sm:$0xff]   ;;  %v2171_v19 = vld [vmem:[%s3062_s1 + $0x2d0] sm:$0xff]  }
  0xf2   :  { %v290_v7 = vpop.f32.mrb[0].mxu0 }
  0xf3   :  { %v650_v20 = vmul.f32 0.020408163, %v290_v7  ;;  %v361_v21 = vpop.f32.mrb[0].mxu1  ;;  %v292_v22 = vpop.f32.mrb[1].mxu0  ;;  %v2172_v7 = vld [vmem:[%s3062_s1 + $0x210] sm:$0xff]  }
  0xf4   :  { %v652_v23 = vmul.f32 0.020408163, %v361_v21  ;;  %v651_v24 = vmul.f32 0.020408163, %v292_v22  ;;  %v363_v25 = vpop.f32.mrb[1].mxu1  ;;  %v2174_v21 = vld [vmem:[%s3062_s1 + $0x258] sm:$0xff]  }
  0xf5   :  { %v653_v26 = vmul.f32 0.020408163, %v363_v25  ;;  %v662_v30 = vpack.c.bf16 %v650_v20, %v650_v20  ;;  %v2173_v20 = vld [vmem:[%s3062_s1 + $0x290] sm:$0xff]   ;;  %v2175_v22 = vld [vmem:[%s3062_s1 + $0x2d8] sm:$0xff]   ;;  %v2178_v25 = vld [vmem:[%s3062_s1 + $0x260] sm:$0xff]  }
  0xf6   :  { %v664_v27 = vpack.c.bf16 %v652_v23, %v652_v23  ;;  %v663_v28 = vpack.c.bf16 %v651_v24, %v651_v24  ;;  %v2176_v23 = vld [vmem:[%s3062_s1 + $0x218] sm:$0xff]  }
  0xf7   :  { %v665_v31 = vpack.c.bf16 %v653_v26, %v653_v26  ;;  %v2177_v24 = vld [vmem:[%s3062_s1 + $0x298] sm:$0xff]   ;;  %v2179_v26 = vld [vmem:[%s3062_s1 + $0x2e0] sm:$0xff]  }
  0xf8   :  { %1481 = vmatprep.mubr.bf16.mxu0 %v663_v28  ;;  %v2181_v28 = vld [vmem:[%s3062_s1 + $0x2a0] sm:$0xff]  }
  0xf9   :  { %1521 = vmatprep.mubr.bf16.mxu1 %v665_v31  ;;  %1482 = vmatmul.mubr.bf16.vlgmr.msra.gmra.mrb[8].mxu0 %v662_v30  ;;  %v2183_v30 = vld [vmem:[%s3062_s1 + $0x2e8] sm:$0xff]  }
  0xfa   :  { %1522 = vmatmul.mubr.bf16.vlgmr.msra.gmra.mrb[8].mxu1 %v664_v27  ;;  %1865 = vmatpush3.bf16.msra.mxu0 %v2132_v29  ;;  %v2180_v27 = vld [vmem:[%s3062_s1 + $0x220] sm:$0xff]   ;;  %v2182_v29 = vld [vmem:[%s3062_s1 + $0x268] sm:$0xff]  }
  0xfb   :  { %1887 = vmatpush3.bf16.msra.mxu1 %v2133_v33  ;;  %1866 = vmatprep.subr.bf16.mxu0 %v2134_v34 }
  0xfc   :  { %1888 = vmatprep.subr.bf16.mxu1 %v2135_v35  ;;  %v2184_v35 = vld [vmem:[%s3062_s1 + $0x228] sm:$0xff]  }
  0xfe   :  { %1867 = vmatpush3.bf16.msra.mxu0 %v2136_v36 }
  0xff   :  { %1889 = vmatpush3.bf16.msra.mxu1 %v2137_v37  ;;  %1868 = vmatprep.subr.bf16.mxu0 %v2138_v38  ;;  %v2185_v38 = vld [vmem:[%s3062_s1 + $0x2a8] sm:$0xff]  }
 0x100   :  { %1890 = vmatprep.subr.bf16.mxu1 %v2139_v39  ;;  %v2186_v39 = vld [vmem:[%s3062_s1 + $0x270] sm:$0xff]  }
 0x102   :  { %1869 = vmatpush3.bf16.msra.mxu0 %v2140_v40 }
 0x103   :  { %1891 = vmatpush3.bf16.msra.mxu1 %v2141_v41  ;;  %1870 = vmatprep.subr.bf16.mxu0 %v2142_v42  ;;  %v2187_v41 = vld [vmem:[%s3062_s1 + $0x2f0] sm:$0xff]  }
 0x104   :  { %1892 = vmatprep.subr.bf16.mxu1 %v2143_v43 }
 0x106   :  { %1871 = vmatpush3.bf16.msra.mxu0 %v2144_v44  ;;  %v2188_v44 = vld [vmem:[%s3062_s1 + $0x230] sm:$0xff]  }
 0x107   :  { %1893 = vmatpush3.bf16.msra.mxu1 %v2145_v45  ;;  %1872 = vmatprep.subr.bf16.mxu0 %v2146_v46  ;;  %v2189_v45 = vld [vmem:[%s3062_s1 + $0x2b0] sm:$0xff]   ;;  %v2190_v46 = vld [vmem:[%s3062_s1 + $0x278] sm:$0xff]  }
 0x108   :  { %1894 = vmatprep.subr.bf16.mxu1 %v2147_v47  ;;  %v2191_v47 = vld [vmem:[%s3062_s1 + $0x2f8] sm:$0xff]  }
 0x10a   :  { %1873 = vmatpush3.bf16.msra.mxu0 %v2148_v48 }
 0x10b   :  { %1895 = vmatpush3.bf16.msra.mxu1 %v2149_v49  ;;  %1874 = vmatprep.subr.bf16.mxu0 %v2150_v50  ;;  %v2192_v49 = vld [vmem:[%s3062_s1 + $0x238] sm:$0xff]  }
 0x10c   :  { %1896 = vmatprep.subr.bf16.mxu1 %v2151_v51  ;;  %v2193_v51 = vld [vmem:[%s3062_s1 + $0x2b8] sm:$0xff]   ;;  %s2219_s1 = smov [#allocation2]  }
 0x10d   :  { %v432_v56 = vpop.f32.mrb[2].mxu0 }
 0x10e   :  { %1875 = vmatpush3.bf16.msra.mxu0 %v2152_v52  ;;  %v503_v57 = vpop.f32.mrb[2].mxu1  ;;  %v434_v59 = vpop.f32.mrb[3].mxu0  ;;  %v654_v1 = vmul.f32 0.020408163, %v432_v56  ;;  %v1723_v56 = vld [vmem:[%s3063_s2] ss:$0 sm:$0xff] }
 0x10f   :  { %1897 = vmatpush3.bf16.msra.mxu1 %v2153_v53  ;;  %1876 = vmatprep.subr.bf16.mxu0 %v2154_v54  ;;  %v655_v60 = vmul.f32 0.020408163, %v434_v59  ;;  %v505_v61 = vpop.f32.mrb[3].mxu1  ;;  %v656_v3 = vmul.f32 0.020408163, %v503_v57  ;;  %s1697_s2 = sshll.u32 %s2219_s1, 4  ;;  %s1698_s2 = int_to_ptr.vmem [resolvable:$true] %s1697_s2 }
 0x110   :  { %1898 = vmatprep.subr.bf16.mxu1 %v2155_v55  ;;  %v657_v63 = vmul.f32 0.020408163, %v505_v61  ;;  %v666_v10 = vpack.c.bf16 %v654_v1, %v654_v1  ;;  %s2194_s25 = scalar_lea.vmem %s1698_s2, 32  ;;  %p2199_p1 = scmp.lt.s32.totalorder %s1698_s2, %s1698_s2 }
 0x111   :  { %v667_v2 = vpack.c.bf16 %v655_v60, %v655_v60  ;;  %v668_v11 = vpack.c.bf16 %v656_v3, %v656_v3  ;;  %p2195_p0 = scmp.ne.s32.totalorder %s1698_s2, %s2194_s25  ;;  %p2200_p2 = scmp.lt.s32.totalorder %s2194_s25, %s2194_s25 }
 0x112   :  { %1877 = vmatpush3.bf16.msra.mxu0 %v2156_v58  ;;  %v669_v4 = vpack.c.bf16 %v657_v63, %v657_v63 }
 0x113   :  { %1899 = vmatpush3.bf16.msra.mxu1 %v2157_v32  ;;  %1878 = vmatprep.subr.bf16.mxu0 %v2158_v62  ;;  %p2201_p3 = por %p2200_p2, %p2199_p1 }
 0x114   :  { %1900 = vmatprep.subr.bf16.mxu1 %v2159_v0  ;;  %1561 = vmatprep.mubr.bf16.mxu0 %v667_v2 }
 0x115   :  { %1601 = vmatprep.mubr.bf16.mxu1 %v669_v4  ;;  %p2202_p4 = pnand %p2201_p3, %p2195_p0 }
 0x116   :  { %1879 = vmatpush3.bf16.msra.mxu0 %v2160_v5 }
 0x117   :  { %1901 = vmatpush3.bf16.msra.mxu1 %v2161_v6  ;;  %1908 = vmatprep.subr.bf16.mxu0 %v2162_v8 }
 0x118   :  { %1930 = vmatprep.subr.bf16.mxu1 %v2163_v9 }
 0x119   :  { %1562 = vmatmul.mubr.bf16.vlgmr.msra.gmra.mrb[12].mxu0 %v666_v10 }
 0x11a   :  { %1602 = vmatmul.mubr.bf16.vlgmr.msra.gmra.mrb[12].mxu1 %v668_v11  ;;  %1909 = vmatpush3.bf16.msra.mxu0 %v2164_v12 }
 0x11b   :  { %1931 = vmatpush3.bf16.msra.mxu1 %v2165_v13  ;;  %1910 = vmatprep.subr.bf16.mxu0 %v2166_v14 }
 0x11c   :  { %1932 = vmatprep.subr.bf16.mxu1 %v2167_v15 }
 0x11e   :  { %1911 = vmatpush3.bf16.msra.mxu0 %v2168_v16 }
 0x11f   :  { %1933 = vmatpush3.bf16.msra.mxu1 %v2169_v17  ;;  %1912 = vmatprep.subr.bf16.mxu0 %v2170_v18 }
 0x120   :  { %1934 = vmatprep.subr.bf16.mxu1 %v2171_v19 }
 0x122   :  { %1913 = vmatpush3.bf16.msra.mxu0 %v2172_v7 }
 0x123   :  { %1935 = vmatpush3.bf16.msra.mxu1 %v2173_v20  ;;  %1914 = vmatprep.subr.bf16.mxu0 %v2174_v21 }
 0x124   :  { %1936 = vmatprep.subr.bf16.mxu1 %v2175_v22 }
 0x126   :  { %1915 = vmatpush3.bf16.msra.mxu0 %v2176_v23 }
 0x127   :  { %1937 = vmatpush3.bf16.msra.mxu1 %v2177_v24  ;;  %1916 = vmatprep.subr.bf16.mxu0 %v2178_v25 }
 0x128   :  { %1938 = vmatprep.subr.bf16.mxu1 %v2179_v26  ;;  %v574_v31 = vpop.f32.mrb[4].mxu0 }
 0x129   :  { %v576_v33 = vpop.f32.mrb[5].mxu0  ;;  %v645_v34 = vpop.f32.mrb[4].mxu1  ;;  %v658_v50 = vmul.f32 0.020408163, %v574_v31 }
 0x12a   :  { %1917 = vmatpush3.bf16.msra.mxu0 %v2180_v27  ;;  %v659_v36 = vmul.f32 0.020408163, %v576_v33  ;;  %v647_v37 = vpop.f32.mrb[5].mxu1  ;;  %v660_v48 = vmul.f32 0.020408163, %v645_v34 }
 0x12b   :  { %1939 = vmatpush3.bf16.msra.mxu1 %v2181_v28  ;;  %1918 = vmatprep.subr.bf16.mxu0 %v2182_v29  ;;  %v661_v40 = vmul.f32 0.020408163, %v647_v37  ;;  %v670_v53 = vpack.c.bf16 %v658_v50, %v658_v50 }
 0x12c   :  { %1940 = vmatprep.subr.bf16.mxu1 %v2183_v30  ;;  %v671_v42 = vpack.c.bf16 %v659_v36, %v659_v36  ;;  %v672_v52 = vpack.c.bf16 %v660_v48, %v660_v48 }
 0x12d   :  { %v673_v43 = vpack.c.bf16 %v661_v40, %v661_v40 }
 0x12e   :  { %1919 = vmatpush3.bf16.msra.mxu0 %v2184_v35  ;;  %1641 = vmatprep.mubr.bf16.mxu0 %v671_v42 }
 0x12f   :  { %1941 = vmatpush3.bf16.msra.mxu1 %v2185_v38  ;;  %1920 = vmatprep.subr.bf16.mxu0 %v2186_v39 }
 0x130   :  { %1942 = vmatprep.subr.bf16.mxu1 %v2187_v41  ;;  %1681 = vmatprep.mubr.bf16.mxu1 %v673_v43 }
 0x132   :  { %1921 = vmatpush3.bf16.msra.mxu0 %v2188_v44 }
 0x133   :  { %1943 = vmatpush3.bf16.msra.mxu1 %v2189_v45  ;;  %1922 = vmatprep.subr.bf16.mxu0 %v2190_v46 }
 0x134   :  { %1944 = vmatprep.subr.bf16.mxu1 %v2191_v47 }
 0x136   :  { %1923 = vmatpush3.bf16.msra.mxu0 %v2192_v49 }
 0x137   :  { %1945 = vmatpush3.bf16.msra.mxu1 %v2193_v51 }
 0x139   :  { %1642 = vmatmul.mubr.bf16.vlgmr.msra.gmra.mrb[16].mxu0 %v670_v53 }
 0x13a   :  { %1682 = vmatmul.mubr.bf16.vlgmr.msra.gmra.mrb[16].mxu1 %v672_v52 }
 0x1cc   :  { %v1836_v54 = vpop.f32.mrb[8].mxu0 }
 0x1cd   :  { %v1858_v55 = vpop.f32.mrb[8].mxu1  ;;  %v1837_v57 = vpop.f32.mrb[9].mxu0 }
 0x1ce   :  { %v1838_v58 = vadd.f32 %v1837_v57, %v1836_v54  ;;  %v1859_v59 = vpop.f32.mrb[9].mxu1  ;;  %v1839_v32 = vpop.f32.mrb[10].mxu0 }
 0x1cf   :  { %v1860_v60 = vadd.f32 %v1859_v59, %v1858_v55  ;;  %v1861_v61 = vpop.f32.mrb[10].mxu1  ;;  %v1840_v62 = vpop.f32.mrb[11].mxu0 }
 0x1d0   :  { %v1484_v63 = vadd.f32 %v1838_v58, %v1723_v56  ;;  %v1862_v0 = vpop.f32.mrb[11].mxu1 }
 0x1d2   :  { %v1524_v1 = vadd.f32 %v1860_v60, %v1484_v63 }
 0x1ec   :  { %v1880_v2 = vpop.f32.mrb[12].mxu0 }
 0x1ed   :  { %v1902_v3 = vpop.f32.mrb[12].mxu1  ;;  %v1881_v4 = vpop.f32.mrb[13].mxu0 }
 0x1ee   :  { %v1882_v5 = vadd.f32 %v1881_v4, %v1880_v2  ;;  %v1903_v6 = vpop.f32.mrb[13].mxu1  ;;  %v1883_v8 = vpop.f32.mrb[14].mxu0 }
 0x1ef   :  { %v1904_v9 = vadd.f32 %v1903_v6, %v1902_v3  ;;  %v1905_v10 = vpop.f32.mrb[14].mxu1  ;;  %v1884_v11 = vpop.f32.mrb[15].mxu0 }
 0x1f0   :  { %v1564_v12 = vadd.f32 %v1882_v5, %v1524_v1  ;;  %v1906_v13 = vpop.f32.mrb[15].mxu1 }
 0x1f2   :  { %v1604_v14 = vadd.f32 %v1904_v9, %v1564_v12 }
 0x20c   :  { %v1924_v15 = vpop.f32.mrb[16].mxu0 }
 0x20d   :  { %v1946_v16 = vpop.f32.mrb[16].mxu1  ;;  %v1925_v17 = vpop.f32.mrb[17].mxu0 }
 0x20e   :  { %v1926_v18 = vadd.f32 %v1925_v17, %v1924_v15  ;;  %v1947_v19 = vpop.f32.mrb[17].mxu1  ;;  %v1927_v7 = vpop.f32.mrb[18].mxu0 }
 0x20f   :  { %v1948_v20 = vadd.f32 %v1947_v19, %v1946_v16  ;;  %v1949_v21 = vpop.f32.mrb[18].mxu1  ;;  %v1928_v22 = vpop.f32.mrb[19].mxu0 }
 0x210   :  { %v1644_v23 = vadd.f32 %v1926_v18, %v1604_v14  ;;  %v1950_v24 = vpop.f32.mrb[19].mxu1 }
 0x212   :  { %v1684_v25 = vadd.f32 %v1948_v20, %v1644_v23 }
 0x214   :  { %1690 = vst.msk [vmem:[#allocation2] sm:$0x3] %vm1689_vm5, %v1684_v25 }
 0x215   :  { %2205 = shalt.err (!%p2202_p4)
}
 0x216   :  { %s2206_s28 = scalar_lea.hbm %s3064_s3, 32 }
 0x217   :  { %p2207_p5 = scmp.ne.s32.totalorder %s3064_s3, %s2206_s28  ;;  %p2210_p6 = scmp.lt.u32.totalorder %s2206_s28, %s3064_s3 }
 0x219   :  { %p2212_p7 = pnand %p2210_p6, %p2207_p5 }
 0x21b   :  { %2215 = shalt.err (!%p2212_p7)
}
 0x21c   :  { %1700 = dma.vmem_to_hbm [thread:$0]  %s1698_s2, 32, %s3064_s3, [#allocation3]  }
 0x21d   :  { %2216 = dma.done.wait [#allocation3], 32  }
 0x21e   :  { %2217 = vsyncadd [#allocation3], 4294967264 }
 0x21f   :  { %1704 = vsyncpa [#allocation3], 1 }

</bundles_post_ra>
